<compile_context>
chip_gen: v6e
topology: v6e:2x2x1
jax: 0.10.0
libtpu: 0.0.40
codegen_flags: <defaults>
</compile_context>

<pallas_src>
import functools
import math

import jax
import jax.numpy as jnp
from jax.experimental import pallas as pl
from jax.experimental.pallas import tpu as pltpu

_LANE = 128
_SUB = 8


def _focal_loss_kernel(x_ref, t_ref, acc_ref, *,
                       alpha, gamma, use_logits, binary_targets,
                       tile_rows, steps_per_core,
                       full_rows, rem_lanes, full_blocks, needs_mask):
    c = pl.program_id(0)          # core / parallel axis
    i = pl.program_id(1)          # sequential reduction axis

    @pl.when(i == 0)
    def _init():
        acc_ref[...] = jnp.zeros_like(acc_ref)

    x = x_ref[...].astype(jnp.float32)    # bf16 streams as bf16, cast in-kernel
    t = t_ref[...].astype(jnp.float32)

    if use_logits:
        if binary_targets:
            # t in {0,1}:  bce = softplus((1-2t)*x),  pt = sigmoid(-(1-2t)*x)
            # 2 heavy EUP ops (exp, log1p) + one approximate reciprocal.
            z = (1.0 - 2.0 * t) * x
            e = jnp.exp(-jnp.abs(z))
            bce = jnp.maximum(z, 0.0) + jnp.log1p(e)
            pt = jnp.where(z > 0.0, e, 1.0) * pl.reciprocal(1.0 + e, approx=True)
        else:
            # general soft targets: stable BCE-with-logits (3 EUP ops)
            bce = (jnp.maximum(x, 0.0) - x * t
                   + jnp.log1p(jnp.exp(-jnp.abs(x))))
            pt = jnp.exp(-bce)
    else:
        if binary_targets:
            # t in {0,1}: pt is just the selected probability -> 1 EUP op (log)
            pt = jnp.where(t >= 0.5, x, 1.0 - x)
            bce = -jnp.maximum(jnp.log(pt), -100.0)   # torch clamps log at -100
        else:
            log_p = jnp.maximum(jnp.log(x), -100.0)
            log_1mp = jnp.maximum(jnp.log(1.0 - x), -100.0)
            bce = -(t * log_p + (1.0 - t) * log_1mp)
            pt = jnp.exp(-bce)

    one_m_pt = 1.0 - pt
    if gamma == 2:
        mod = one_m_pt * one_m_pt          # VPU multiply, no EUP pow
    elif gamma == 1:
        mod = one_m_pt
    elif gamma == 0:
        mod = jnp.ones_like(one_m_pt)
    else:
        mod = one_m_pt ** gamma            # general fallback
    f_loss = jnp.float32(alpha) * mod * bce

    def _accumulate(vals):
        # (tile_rows,128) -> sum over groups of 8 rows -> (8,128): pure VPU adds,
        # no cross-lane/XLU work and no scalar RMW on the hot path.
        acc_ref[...] += vals.reshape(-1, _SUB, _LANE).sum(axis=0)

    if needs_mask:
        # Global row-block index of this step.  Only tail blocks (partial rows /
        # partial lanes / fully out-of-range coverage blocks) pay for the mask.
        b = c * steps_per_core + i

        @pl.when(b < full_blocks)
        def _fast():
            _accumulate(f_loss)

        @pl.when(b >= full_blocks)
        def _ragged():
            shape = f_loss.shape
            row_g = b * tile_rows + jax.lax.broadcasted_iota(jnp.int32, shape, 0)
            valid = row_g < full_rows              # rows with all 128 lanes valid
            if rem_lanes:                          # partially valid boundary row
                col = jax.lax.broadcasted_iota(jnp.int32, shape, 1)
                valid = valid | ((row_g == full_rows) & (col < rem_lanes))
            _accumulate(jnp.where(valid, f_loss, 0.0))
    else:
        _accumulate(f_loss)


def _cdiv(a, b):
    return -(-a // b)


def focal_loss(inputs, targets, *, alpha=1.0, gamma=2.0, logits=False,
               binary_targets=False, reduction="elementwise_mean",
               tile_rows=8192, num_cores=2):
    """Focal loss, mean reduction (module default). inputs/targets: same shape.

    binary_targets=True is a static fast path for 0/1 targets (fewer EUP ops).
    Passing bf16 / low-precision binary targets reduces HBM traffic further; the
    kernel streams native dtypes and casts to f32 on-chip.
    """
    assert inputs.shape == targets.shape
    if reduction is None:
        # TODO(synk): reduction=None (per-element output) path not implemented;
        # only the reduced (mean) output is supported here.
        raise NotImplementedError("reduction=None not implemented")
    # NOTE: the reference module applies torch.mean for ANY non-None reduction
    # value (it never dispatches on the string), so every non-None value is a
    # mean here as well.

    total = int(math.prod(inputs.shape)) if inputs.shape else 1
    full_rows, rem_lanes = divmod(total, _LANE)    # fully-valid rows / tail lanes
    n_rows = full_rows + (1 if rem_lanes else 0)

    x = inputs.reshape(-1)
    t = targets.reshape(-1)

    # Lane alignment only: pad to the next 128 multiple (<=127 elems) when the
    # element count is ragged; tiny arrays (<8 rows) also pad up to 8 rows so the
    # block sublane dim stays a multiple of 8.  Zero-copy in the aligned case.
    if n_rows < _SUB:
        n_rows = _SUB
    pad = n_rows * _LANE - total
    if pad:
        # padded elements are masked out in-kernel; 0.5 is log-safe either way
        x = jnp.pad(x, (0, pad), constant_values=0.5)
        t = jnp.pad(t, (0, pad), constant_values=0.5)
    x2 = x.reshape(n_rows, _LANE)
    t2 = t.reshape(n_rows, _LANE)

    # Tile selection: multiple of 8 rows, capped per core so medium inputs still
    # split across both v7x TensorCores; never larger than the array.
    cores = max(1, int(num_cores))
    tile = max(_SUB, (int(tile_rows) // _SUB) * _SUB)
    per_core = _cdiv(n_rows, cores)
    tile = min(tile, max(_SUB, (per_core // _SUB) * _SUB))

    nb = _cdiv(n_rows, tile)              # row-blocks actually needed
    cores = min(cores, nb)
    steps = _cdiv(nb, cores)              # sequential steps per core
    full_blocks = full_rows // tile       # blocks that are entirely valid
    needs_mask = (cores * steps != full_blocks)

    if cores * steps > nb:
        # some trailing (core, step) slots have no real block: clamp the DMA to
        # the last real block; their contribution is fully masked in-kernel.
        def in_map(c, i):
            return (jnp.minimum(c * steps + i, nb - 1), 0)
    else:
        def in_map(c, i):
            return (c * steps + i, 0)

    kernel = functools.partial(
        _focal_loss_kernel,
        alpha=float(alpha), gamma=gamma, use_logits=bool(logits),
        binary_targets=bool(binary_targets),
        tile_rows=tile, steps_per_core=steps,
        full_rows=full_rows, rem_lanes=rem_lanes,
        full_blocks=full_blocks, needs_mask=needs_mask,
    )

    partials = pl.pallas_call(
        kernel,
        # one resident (8,128) vector accumulator block per core
        out_shape=jax.ShapeDtypeStruct((cores * _SUB, _LANE), jnp.float32),
        grid=(cores, steps),
        in_specs=[
            pl.BlockSpec((tile, _LANE), in_map),
            pl.BlockSpec((tile, _LANE), in_map),
        ],
        out_specs=pl.BlockSpec((_SUB, _LANE), lambda c, i: (c, 0)),
        compiler_params=pltpu.CompilerParams(
            dimension_semantics=("parallel", "arbitrary"),
            vmem_limit_bytes=48 * 1024 * 1024,
        ),
    )(x2, t2)

    # final cross-core add, cross-lane reduce and divide by the GLOBAL count
    return jnp.sum(partials) / jnp.float32(total)


def _reference(inputs, targets, *, alpha=1.0, gamma=2.0, logits=False):
    inputs = inputs.astype(jnp.float32)
    targets = targets.astype(jnp.float32)
    if logits:
        bce = (jnp.maximum(inputs, 0.0) - inputs * targets
               + jnp.log1p(jnp.exp(-jnp.abs(inputs))))
    else:
        bce = -(targets * jnp.maximum(jnp.log(inputs), -100.0)
                + (1.0 - targets) * jnp.maximum(jnp.log(1.0 - inputs), -100.0))
    pt = jnp.exp(-bce)
    return jnp.mean(alpha * (1.0 - pt) ** gamma * bce)


if __name__ == "__main__":
    key = jax.random.PRNGKey(0)
    ks = jax.random.split(key, 8)

    # A: module defaults (alpha=1, gamma=2, logits=False, mean), f32 probabilities
    shape = (2, 4, 16, 16)
    probs = jax.nn.sigmoid(jax.random.normal(ks[0], shape, dtype=jnp.float32))
    tgt = jax.random.bernoulli(ks[1], 0.5, shape).astype(jnp.float32)
    ref = _reference(probs, tgt)
    loss = jax.block_until_ready(focal_loss(probs, tgt))
    assert jnp.allclose(loss, ref, rtol=1e-5, atol=1e-6), ("A", loss, ref)

    # A2: same data through the binary-targets fast path (1 transcendental/elem)
    loss = jax.block_until_ready(focal_loss(probs, tgt, binary_targets=True))
    assert jnp.allclose(loss, ref, rtol=1e-5, atol=1e-6), ("A2", loss, ref)

    # B: logits path, bf16 inputs, ragged numel (lane padding + ragged mask)
    shape2 = (3, 5, 7)
    lg = jax.random.normal(ks[2], shape2, dtype=jnp.bfloat16)
    tgt2 = jax.random.bernoulli(ks[3], 0.5, shape2).astype(jnp.bfloat16)
    ref2 = _reference(lg, tgt2, alpha=0.25, logits=True)
    loss2 = jax.block_until_ready(focal_loss(lg, tgt2, alpha=0.25, logits=True))
    assert jnp.allclose(loss2, ref2, rtol=1e-4, atol=1e-5), ("B", loss2, ref2)

    # C: logits + binary_targets fast path, bf16, multi-step grid with a masked
    #    tail block (partial rows and partial lanes)
    shape3 = (2, 3, 50, 50)
    lg3 = jax.random.normal(ks[4], shape3, dtype=jnp.bfloat16)
    tgt3 = jax.random.bernoulli(ks[5], 0.5, shape3).astype(jnp.bfloat16)
    ref3 = _reference(lg3, tgt3, alpha=0.25, logits=True)
    loss3 = jax.block_until_ready(
        focal_loss(lg3, tgt3, alpha=0.25, logits=True, binary_targets=True,
                   tile_rows=16))
    assert jnp.allclose(loss3, ref3, rtol=5e-3, atol=1e-5), ("C", loss3, ref3)

    # D: default large-tile config, f32, 2M elements, split across both cores
    shape4 = (128, 128, 128)
    probs4 = jax.nn.sigmoid(jax.random.normal(ks[6], shape4, dtype=jnp.float32))
    tgt4 = jax.random.bernoulli(ks[7], 0.5, shape4).astype(jnp.float32)
    ref4 = _reference(probs4, tgt4)
    loss4 = jax.block_until_ready(focal_loss(probs4, tgt4))
    assert jnp.allclose(loss4, ref4, rtol=1e-4, atol=1e-6), ("D", loss4, ref4)

    # E: odd block count -> exercises the clamped index_map and a fully
    #    out-of-range (entirely masked) trailing block slot on core 1
    shape5 = (2, 12, 128)   # 3072 elems = 24 rows, tile_rows=8 -> 3 blocks, 2 cores
    probs5 = jax.nn.sigmoid(jax.random.normal(ks[0], shape5, dtype=jnp.float32))
    tgt5 = jax.random.bernoulli(ks[1], 0.5, shape5).astype(jnp.float32)
    ref5 = _reference(probs5, tgt5)
    loss5 = jax.block_until_ready(focal_loss(probs5, tgt5, tile_rows=8))
    assert jnp.allclose(loss5, ref5, rtol=1e-5, atol=1e-6), ("E", loss5, ref5)

    print("KERNEL_OK")
</pallas_src>

<mosaic_0001>
module attributes {stable_mosaic.version = 11 : i64} {
  func.func @_focal_loss_kernel(%arg0: i32, %arg1: i32, %arg2: memref<8x128xf32, #tpu.memory_space<vmem>>, %arg3: memref<8x128xf32, #tpu.memory_space<vmem>>, %arg4: memref<8x128xf32, #tpu.memory_space<vmem>>) attributes {dimension_semantics = [#tpu.dimension_semantics<parallel>, #tpu.dimension_semantics<arbitrary>], iteration_bounds = array<i64: 2, 1>, scalar_prefetch = 0 : i64, scratch_operands = 0 : i64, tpu.core_type = #tpu.core_type<tc>, window_params = [{transform_indices = @transform_0, window_bounds = array<i64: 8, 128>}, {transform_indices = @transform_1, window_bounds = array<i64: 8, 128>}, {transform_indices = @transform_2, window_bounds = array<i64: 8, 128>}]} {
    %c0_i32 = arith.constant 0 : i32
    %0 = arith.cmpi eq, %arg1, %c0_i32 : i32
    %1 = arith.extui %0 : i1 to i32
    %c0_i32_0 = arith.constant 0 : i32
    %2 = arith.cmpi ne, %1, %c0_i32_0 : i32
    scf.if %2 {
      %cst_16 = arith.constant 0.000000e+00 : f32
      %34 = vector.broadcast %cst_16 : f32 to vector<8x128xf32>
      %c0_17 = arith.constant 0 : index
      %c0_18 = arith.constant 0 : index
      %35 = vector.load %arg4[%c0_17, %c0_18] : memref<8x128xf32, #tpu.memory_space<vmem>>, vector<8x128xf32>
      tpu.vector_store %arg4[%c0_17, %c0_18], %34 {strides = array<i32>} : memref<8x128xf32, #tpu.memory_space<vmem>>, vector<8x128xf32>,
    } else {
    }
    %c0 = arith.constant 0 : index
    %c0_1 = arith.constant 0 : index
    %3 = vector.load %arg2[%c0, %c0_1] : memref<8x128xf32, #tpu.memory_space<vmem>>, vector<8x128xf32>
    %c0_2 = arith.constant 0 : index
    %c0_3 = arith.constant 0 : index
    %4 = vector.load %arg3[%c0_2, %c0_3] : memref<8x128xf32, #tpu.memory_space<vmem>>, vector<8x128xf32>
    %5 = math.log %3 : vector<8x128xf32>
    %cst = arith.constant -1.000000e+02 : f32
    %6 = vector.broadcast %cst : f32 to vector<8x128xf32>
    %7 = arith.maximumf %5, %6 : vector<8x128xf32>
    %cst_4 = arith.constant 1.000000e+00 : f32
    %8 = vector.broadcast %cst_4 : f32 to vector<8x128xf32>
    %9 = arith.subf %8, %3 : vector<8x128xf32>
    %10 = math.log %9 : vector<8x128xf32>
    %cst_5 = arith.constant -1.000000e+02 : f32
    %11 = vector.broadcast %cst_5 : f32 to vector<8x128xf32>
    %12 = arith.maximumf %10, %11 : vector<8x128xf32>
    %13 = arith.mulf %4, %7 : vector<8x128xf32>
    %cst_6 = arith.constant 1.000000e+00 : f32
    %14 = vector.broadcast %cst_6 : f32 to vector<8x128xf32>
    %15 = arith.subf %14, %4 : vector<8x128xf32>
    %16 = arith.mulf %15, %12 : vector<8x128xf32>
    %17 = arith.addf %13, %16 : vector<8x128xf32>
    %cst_7 = arith.constant 0.000000e+00 : f32
    %18 = vector.broadcast %cst_7 : f32 to vector<8x128xf32>
    %19 = arith.subf %18, %17 : vector<8x128xf32>
    %cst_8 = arith.constant 0.000000e+00 : f32
    %20 = vector.broadcast %cst_8 : f32 to vector<8x128xf32>
    %21 = arith.subf %20, %19 : vector<8x128xf32>
    %22 = math.exp %21 : vector<8x128xf32>
    %cst_9 = arith.constant 1.000000e+00 : f32
    %23 = vector.broadcast %cst_9 : f32 to vector<8x128xf32>
    %24 = arith.subf %23, %22 : vector<8x128xf32>
    %25 = arith.mulf %24, %24 : vector<8x128xf32>
    %cst_10 = arith.constant 1.000000e+00 : f32
    %26 = vector.broadcast %cst_10 : f32 to vector<8x128xf32>
    %27 = arith.mulf %26, %25 : vector<8x128xf32>
    %28 = arith.mulf %27, %19 : vector<8x128xf32>
    %c0_11 = arith.constant 0 : index
    %c0_12 = arith.constant 0 : index
    %29 = vector.load %arg4[%c0_11, %c0_12] : memref<8x128xf32, #tpu.memory_space<vmem>>, vector<8x128xf32>
    %30 = vector.shape_cast %28 : vector<8x128xf32> to vector<1x8x128xf32>
    %cst_13 = arith.constant dense<0.000000e+00> : vector<8x128xf32>
    %31 = vector.multi_reduction <add>, %30, %cst_13 [0] : vector<1x8x128xf32> to vector<8x128xf32>
    %32 = arith.addf %29, %31 : vector<8x128xf32>
    %c0_14 = arith.constant 0 : index
    %c0_15 = arith.constant 0 : index
    %33 = vector.load %arg4[%c0_14, %c0_15] : memref<8x128xf32, #tpu.memory_space<vmem>>, vector<8x128xf32>
    tpu.vector_store %arg4[%c0_14, %c0_15], %32 {strides = array<i32>} : memref<8x128xf32, #tpu.memory_space<vmem>>, vector<8x128xf32>,
    return
  }
  func.func @transform_0(%arg0: i32, %arg1: i32) -> (i32, i32) {
    %c1_i32 = arith.constant 1 : i32
    %0 = arith.muli %arg0, %c1_i32 : i32
    %1 = arith.addi %0, %arg1 : i32
    %c0_i32 = arith.constant 0 : i32
    %c0_i32_0 = arith.constant 0 : i32
    return %1, %c0_i32 : i32, i32
  }
  func.func @transform_1(%arg0: i32, %arg1: i32) -> (i32, i32) {
    %c1_i32 = arith.constant 1 : i32
    %0 = arith.muli %arg0, %c1_i32 : i32
    %1 = arith.addi %0, %arg1 : i32
    %c0_i32 = arith.constant 0 : i32
    %c0_i32_0 = arith.constant 0 : i32
    return %1, %c0_i32 : i32, i32
  }
  func.func @transform_2(%arg0: i32, %arg1: i32) -> (i32, i32) {
    %c0_i32 = arith.constant 0 : i32
    %c0_i32_0 = arith.constant 0 : i32
    return %arg0, %c0_i32 : i32, i32
  }
}

</mosaic_0001>

<bundles_post_ra>
// kernel: tpu_custom_call.1
= control target key start
LH: loop header
LB: loop body
LE: loop exit
PB: predicated region body
PF: predicated region fallthrough
CT: control target
= control target key end

     0   :  { %7 = vsyncpa [#allocation3], 0  ;;  %s778_s0 = inlined_call_operand.hbm [shape: f32[16,128], index: 0, kind: input, shape index: {}]   ;;  %s779_s1 = inlined_call_operand.hbm [shape: f32[16,128], index: 1, kind: input, shape index: {}]   ;;  %s780_s2 = inlined_call_operand.hbm [shape: f32[16,128], index: 2, kind: output, shape index: {}]  }
   0x1   :  { %9 = vsyncpa [#allocation3 + $0x1], 0 }
   0x2   :  { %10 = vsyncpa [#allocation6], 0 }
   0x3   :  { %12 = vsyncpa [#allocation6 + $0x1], 0 }
   0x4   :  { %13 = vsyncpa [#allocation4], 0 }
   0x5   :  { %15 = vsyncpa [#allocation4 + $0x1], 0  ;;  %s612_s9 = smov 0   ;;  %s614_s10 = smov 0  }
   0x6   :  { %s616_s11 = smov 0   ;;  %s618_s12 = smov 0  }
   0x7   :  { %s620_s13 = smov 0   ;;  %s622_s14 = smov 0  }
   0x8 LB: > { %s362_s15 = sadd.s32 4294967295, %s592_s14   ;;  %s363_s16 = sadd.s32 4294967294, %s592_s14   ;;  %s592_s14 = sphi %s622_s14, %s21_s14   ;;  %s588_s13 = sphi %s620_s13, %s792_s13   ;;  %s584_s12 = sphi %s618_s12, %s791_s12   ;;  %s580_s11 = sphi %s616_s11, %s790_s11   ;;  %s576_s10 = sphi %s614_s10, %s789_s10   ;;  %s572_s9 = sphi %s612_s9, %s788_s9  }
   0x9   : > { %s33_s17 = sadd.s32 1, %s588_s13  ;;  %s42_s18 = sadd.s32 1, %s580_s11 }
   0xa   : > { %p35_p0 = scmp.ge.s32.totalorder %s33_s17, 2  ;;  %p49_p1 = scmp.ne.s32.totalorder %s580_s11, %s576_s10 }
   0xb   : > { %p50_p2 = scmp.eq.s32.totalorder %s592_s14, 0  ;;  %p55_p3 = scmp.ne.s32.totalorder %s576_s10, %s572_s9 }
   0xc   : > { %s794_s17 = smov (%p35_p0, %s33_s17), 0  ;;  %p56_p5 = scmp.eq.s32.totalorder %s362_s15, 0 }
   0xd   : > { %p653_p4 = por %p50_p2, %p49_p1  ;;  %s39_s20 = ssub.s32 %s588_s13, %s794_s17 }
   0xe   : > { %p107_p6 = scmp.eq.s32.totalorder %s362_s15, 1  ;;  %p40_p7 = scmp.eq.s32.totalorder %s39_s20, 0 }
   0xf   : > { %p659_p8 = por %p56_p5, %p55_p3  ;;  %p113_p10 = scmp.eq.s32.totalorder %s363_s16, 1 }
  0x10   : > { %p663_p9 = por %p107_p6, %p49_p1  ;;  %p395_p13 = scmp.lt.s32.totalorder %s592_s14, 2 }
  0x11   : > { %s668_s23 = scalar_select %p40_p7, %s580_s11, %s42_s18  }
  0x12   : > { %p670_p11 = por %p113_p10, %p55_p3  ;;  %s677_s25 = sand.u32 1, %s580_s11  }
  0x13   : > { %s366_s26 = sshll.u32 %s677_s25, 3  ;;  %s367_s27 = sshll.u32 %s588_s13, 7 }
  0x14   : > { %s143_s30 = scalar_lea.hbm %s778_s0, %s367_s27  ;;  %s137_s3 = scalar_lea.vmem [#allocation2], %s366_s26 }
  0x15   : > { %s145_s4 = sshll.u32 %s137_s3, 4  ;;  %p686_p0 = pnand %p395_p13, %p653_p4  ;;  %s146_s4 = int_to_ptr.vmem [resolvable:$true] %s145_s4 }
  0x16   : > { %p370_p1 = scmp.ge.s32.totalorder %s592_s14, 1  ;;  %p169_p2 = scmp.lt.s32.totalorder %s592_s14, 3 }
  0x17   : > { %s134_s6 = scalar_lea.sflag [#allocation3], %s677_s25  ;;  %p454_p3 = pneg %p686_p0 }
  0x18   : > { %s465_s7 = scalar_lea.vmem %s146_s4, 128  ;;  %s594_s8 = smov [#allocation2]  }
  0x19   : > { %p466_p5 = scmp.ne.s32.totalorder %s146_s4, %s465_s7  ;;  %s470_s15 = sshll.u32 %s594_s8, 4  ;;  %s471_s15 = int_to_ptr.vmem [resolvable:$false] %s470_s15 }
  0x1a   : > { %s472_s16 = scalar_lea.vmem %s471_s15, 256  ;;  %p473_p4 = scmp.lt.s32.totalorder %s146_s4, %s471_s15 }
  0x1b   : > { %p468_p6 = pnand %p466_p5, %p454_p3  ;;  %p474_p10 = scmp.lt.s32.totalorder %s472_s16, %s465_s7 }
  0x1d   : > { %p469_p7 = pneg %p468_p6  ;;  %p475_p13 = por %p474_p10, %p473_p4 }
  0x1f   : > { %p476_p12 = pnand %p475_p13, %p469_p7 }
  0x21   : > { %479 = shalt.err (!%p476_p12)
}
  0x22   : > { %387 = dma.hbm_to_vmem [thread:$0]  (!%p686_p0), %s143_s30, 128, %s146_s4, %s134_s6  }
  0x23   : > { %p704_p5 = pnand %p370_p1, %p169_p2  ;;  %s162_s28 = scalar_lea.hbm %s779_s1, %s367_s27 }
  0x24   : > { %s156_s29 = scalar_lea.vmem [#allocation5], %s366_s26  ;;  %s153_s7 = scalar_lea.sflag [#allocation6], %s677_s25 }
  0x25   : > { %s164_s3 = sshll.u32 %s156_s29, 4  ;;  %s595_s30 = smov [#allocation5]   ;;  %s165_s3 = int_to_ptr.vmem [resolvable:$true] %s164_s3 }
  0x26   : > { %s493_s8 = scalar_lea.vmem %s165_s3, 128  ;;  %s498_s4 = sshll.u32 %s595_s30, 4  ;;  %s499_s4 = int_to_ptr.vmem [resolvable:$false] %s498_s4 }
  0x27   : > { %p494_p12 = scmp.ne.s32.totalorder %s165_s3, %s493_s8  ;;  %s500_s6 = scalar_lea.vmem %s499_s4, 256 }
  0x28   : > { %p501_p1 = scmp.lt.s32.totalorder %s165_s3, %s499_s4  ;;  %p502_p2 = scmp.lt.s32.totalorder %s500_s6, %s493_s8 }
  0x29   : > { %p496_p6 = pnand %p494_p12, %p454_p3 }
  0x2a   : > { %p503_p4 = por %p502_p2, %p501_p1 }
  0x2b   : > { %p497_p7 = pneg %p496_p6 }
  0x2d   : > { %p504_p10 = pnand %p503_p4, %p497_p7 }
  0x2f   : > { %507 = shalt.err (!%p504_p10)
}
  0x30   : > { %390 = dma.hbm_to_vmem [thread:$0]  (!%p686_p0), %s162_s28, 128, %s165_s3, %s153_s7  }
  0x31   : > { %173 = sbr.rel (%p704_p5) target bundleno = 121 (0x79), region = 28  ;;  %s720_s25 = sand.u32 (!%p704_p5), 1, %s576_s10  }
  0x32   : > { %s723_s26 = sshll.u32 (!%p704_p5), %s720_s25, 3  ;;  %s176_s27 = scalar_lea.sflag (!%p704_p5), [#allocation3], %s720_s25 }
  0x33   : > { %s179_s15 = scalar_lea.vmem (!%p704_p5), [#allocation2], %s723_s26 }
  0x36   : > { %559 = dma.done.wait (%p659_p8), %s176_s27, 128  }
  0x37   : > { %561 = vsyncadd (%p659_p8), %s176_s27, 4294967168  ;;  %s185_s5 = scalar_lea.sflag [#allocation6], %s720_s25  ;;  %s188_s16 = scalar_lea.vmem [#allocation5], %s723_s26 }
  0x38   : > { %563 = dma.done.wait (%p659_p8), %s185_s5, 128  }
  0x39   : > { %565 = vsyncadd (%p659_p8), %s185_s5, 4294967168  ;;  %v221_v0 = vld [vmem:[%s179_s15] sm:$0xff]  ;;  %v222_v3 = vld [vmem:[%s188_s16] sm:$0xff]  ;;  %s375_s21 = sshll.u32 %s584_s12, 7  ;;  %s213_s18 = scalar_lea.vmem [#allocation7], %s723_s26 }
  0x3a   : > { %446 = vlog2.f32 %v221_v0  ;;  %v226_v1 = vsub.f32 1.0, %v221_v0  ;;  %v231_v8 = vsub.f32 1.0, %v222_v3  ;;  %s259_s19 = sshll.u32 %s213_s18, 4  ;;  %s257_s29 = scalar_lea.hbm %s780_s2, %s375_s21  ;;  %s260_s19 = int_to_ptr.vmem [resolvable:$true] %s259_s19 }
  0x3b   : > { %s246_s3 = scalar_lea.sflag [#allocation4], %s720_s25  ;;  %s508_s7 = scalar_lea.vmem %s260_s19, 128 }
  0x3c   : > { %448 = vlog2.f32 %v226_v1  ;;  %p509_p8 = scmp.ne.s32.totalorder %s260_s19, %s508_s7  ;;  %s596_s8 = smov [#allocation7]  }
  0x3d   : > { %s512_s30 = sshll.u32 %s596_s8, 4  ;;  %s513_s30 = int_to_ptr.vmem [resolvable:$false] %s512_s30 }
  0x3e   : > { %p510_p0 = pnand %p509_p8, %p663_p9  ;;  %s514_s4 = scalar_lea.vmem %s513_s30, 256 }
  0x3f   : > { %p515_p13 = scmp.lt.s32.totalorder %s260_s19, %s513_s30  ;;  %p516_p5 = scmp.lt.s32.totalorder %s514_s4, %s508_s7 }
  0x40   : > { %p511_p3 = pneg %p510_p0 }
  0x41   : > { %p517_p12 = por %p516_p5, %p515_p13 }
  0x43   : > { %p518_p6 = pnand %p517_p12, %p511_p3 }
  0x47   : > { %v447_v2 = vpop.eup %446 }
  0x48   : > { %v224_v4 = vmul.f32 0.6931472, %v447_v2 }
  0x49   : > { %v449_v5 = vpop.eup %448 }
  0x4a   : > { %v225_v6 = vmax.f32 %v224_v4, -100.0  ;;  %v228_v7 = vmul.f32 0.6931472, %v449_v5 }
  0x4c   : > { %v229_v9 = vmax.f32 %v228_v7, -100.0  ;;  %v230_v10 = vmul.f32 %v225_v6, %v222_v3 }
  0x4e   : > { %v232_v11 = vmul.f32 %v231_v8, %v229_v9 }
  0x50   : > { %v233_v12 = vadd.f32 %v232_v11, %v230_v10 }
  0x52   : > { %v234_v13 = vsub.f32 0.0, %v233_v12 }
  0x54   : > { %v235_v14 = vsub.f32 0.0, %v234_v13 }
  0x56   : > { %v236_v15 = vmul.f32 1.442695, %v235_v14 }
  0x58   : > { %450 = vpow2.f32 %v236_v15 }
  0x65   : > { %v451_v16 = vpop.eup %450 }
  0x66   : > { %v238_v17 = vsub.f32 1.0, %v451_v16 }
  0x68   : > { %v239_v18 = vmul.f32 %v238_v17, %v238_v17 }
  0x6a   : > { %v240_v19 = vmul.f32 %v239_v18, %v234_v13 }
  0x6c   : > { %244 = vst [vmem:[%s213_s18] sm:$0xff] %v240_v19 }
  0x6d   : > { %521 = shalt.err (!%p518_p6)
}
  0x6e   : > { %s522_s12 = scalar_lea.hbm %s257_s29, 128  ;;  %s526_s26 = scalar_lea.hbm %s780_s2, 256 }
  0x6f   : > { %p523_p7 = scmp.ne.s32.totalorder %s257_s29, %s522_s12  ;;  %p527_p4 = scmp.lt.s32.totalorder %s257_s29, %s780_s2 }
  0x70   : > { %p528_p10 = scmp.lt.s32.totalorder %s526_s26, %s522_s12 }
  0x71   : > { %p524_p1 = pnand %p523_p7, %p663_p9 }
  0x72   : > { %p529_p8 = por %p528_p10, %p527_p4 }
  0x73   : > { %p525_p2 = pneg %p524_p1 }
  0x75   : > { %p530_p0 = pnand %p529_p8, %p525_p2 }
  0x77   : > { %533 = shalt.err (!%p530_p0)
}
  0x78   : > { %382 = dma.vmem_to_hbm [thread:$0]  (%p663_p9), %s260_s19, 128, %s257_s29, %s246_s3  }
  0x79 PF: > { %s271_s5 = sand.u32 1, %s572_s9   ;;  %p787_p3 = scmp.ge.s32.totalorder %s592_s14, 2 }
  0x7a   : > { %s272_s16 = scalar_lea.sflag [#allocation4], %s271_s5 }
  0x7b   : > { %p392_p13 = pnand %p787_p3, %p670_p11 }
  0x7d   : > { %p393_p5 = pneg %p392_p13 }
  0x7f   : > { %567 = dma.done.wait (%p393_p5), %s272_s16, 128  }
  0x80   : > { %569 = vsyncadd (%p393_p5), %s272_s16, 4294967168  ;;  %s21_s14 = sadd.s32 1, %s592_s14   ;;  %s788_s9 = smov %s576_s10 }
  0x81   : > { %p18_p12 = scmp.ge.s32.totalorder %s21_s14, 4   ;;  %s789_s10 = smov %s580_s11 }
  0x82   : > { %s790_s11 = smov %s668_s23  ;;  %s791_s12 = smov %s588_s13 }
  0x83   : > { %s792_s13 = smov %s794_s17  ;;  %20 = sbr.rel (!%p18_p12) target bundleno = 8 (0x8), region = 90 }
  0x88   :  { %277 = vsyncpa [#allocation3], 1 }
  0x89   :  { %279 = vsyncpa [#allocation3 + $0x1], 1 }
  0x8a   :  { %280 = vsyncpa [#allocation6], 1 }
  0x8b   :  { %282 = vsyncpa [#allocation6 + $0x1], 1 }
  0x8c   :  { %283 = vsyncpa [#allocation4], 1 }
  0x8d   :  { %285 = vsyncpa [#allocation4 + $0x1], 1 }

</bundles_post_ra>
